<compile_context>
chip_gen: v7x
topology: tpu7x:2x2x1
jax: 0.10.0
libtpu: 0.0.40
codegen_flags: <defaults>
</compile_context>

<pallas_src>
import functools

import jax
import jax.numpy as jnp
from jax.experimental import pallas as pl
from jax.experimental.pallas import tpu as pltpu

MAXPAD = 3                  # largest "same" padding among the 4 branches (kernel_size=7)
NTAPS = 2 * MAXPAD + 1      # 7 shifted taps cover all four kernel sizes (1, 3, 5, 7)


def _round_up(n, m):
    return (n + m - 1) // m * m


def _encoder_kernel(x_ref, w_ref, b_ref, out_ref, hsum_ref, xpad_ref, *, T, TT):
    # x_ref   : (1, T, C_in)              unpadded input, full time axis (resident per b)
    # w_ref   : (NTAPS, C_in, dim)        fused, zero-padded conv weights (tap-major)
    # b_ref   : (1, dim)                  fused conv bias
    # out_ref : (1, TT, dim)              output time tile
    # hsum_ref: (1, 1, dim)               running sum over time (resident across the t axis)
    # xpad_ref: (NT*TT + 2*MAXPAD, C_in)  VMEM scratch: zero-padded copy of x, built at t==0
    t = pl.program_id(1)
    dim = out_ref.shape[2]

    # Build the zero-padded input once per batch element (t iterates fastest within b).
    @pl.when(t == 0)
    def _():
        xpad_ref[...] = jnp.zeros_like(xpad_ref)
        xpad_ref[pl.ds(MAXPAD, T), :] = x_ref[0]
        hsum_ref[...] = jnp.zeros_like(hsum_ref)

    t_start = pl.multiple_of(t * TT, TT)

    # One dim-wide accumulator; 7 shifted-tap matmuls (MXU), f32 accumulation.
    acc = jnp.zeros((TT, dim), jnp.float32)
    for k in range(NTAPS):                                # static, unrolled taps
        tap = xpad_ref[pl.ds(t_start + k, TT), :]         # (TT, C_in) shifted window
        acc = acc + jnp.dot(tap, w_ref[k], preferred_element_type=jnp.float32)

    out = jnp.maximum(acc + b_ref[...], 0.0)              # fused bias + ReLU
    out_ref[0] = out.astype(out_ref.dtype)

    # Time-sum contribution of this tile (mask padded rows only if the last tile is ragged).
    if T % TT != 0:
        row = t_start + jax.lax.broadcasted_iota(jnp.int32, (TT, 1), 0)
        out = jnp.where(row < T, out, 0.0)
    tile_sum = jnp.sum(out, axis=0, keepdims=True)        # (1, dim)
    hsum_ref[0] = hsum_ref[0] + tile_sum.astype(hsum_ref.dtype)


def pack_conv_params(branch_params):
    """Fuse per-branch conv params into (W_all: (7, C_in, dim), b_all: (1, dim)).

    branch_params = (w1, b1, w3, b3, w5, b5, w7, b7) with wK: (K, C_in, dim//4),
    bK: (1, dim//4).  Zero taps are inserted where a branch's kernel does not cover the
    offset; channel order matches torch.cat([o1, o3, o5, o7], dim=1).
    """
    ws = branch_params[0::2]
    bs = branch_params[1::2]
    c_in = ws[0].shape[1]
    c4 = ws[0].shape[2]
    dim = 4 * c4
    w_all = jnp.zeros((NTAPS, c_in, dim), jnp.float32)
    for i, w in enumerate(ws):
        k_size = w.shape[0]
        pad = (k_size - 1) // 2
        w_all = w_all.at[MAXPAD - pad:MAXPAD + pad + 1, :, i * c4:(i + 1) * c4].set(w)
    b_all = jnp.concatenate(bs, axis=1)                   # (1, dim)
    return w_all, b_all


def encoder_forward(x, fused_params, *, time_tile=512, compute_dtype=None):
    """x: (B, T, C_in) float32. fused_params = (W_all, b_all).

    Returns (output, (h0, c0)) matching the PyTorch Encoder (ConformerBlock = identity).
    Optionally cast matmul inputs to `compute_dtype` (e.g. jnp.bfloat16) — accumulation
    stays f32 via preferred_element_type.
    """
    B, T, C_in = x.shape
    w_all, b_all = fused_params
    dim = w_all.shape[2]

    if compute_dtype is not None:
        x = x.astype(compute_dtype)
        w_all = w_all.astype(compute_dtype)

    # Time tile: multiple of 8 (sublane) unless it equals the full time extent.
    TT = T if T <= time_tile else max(8, (time_tile // 8) * 8)
    NT = pl.cdiv(T, TT)

    # VMEM budget (double-buffered blocks + weights + padded-input scratch), lane-padded.
    lane, f32b = 128, 4
    isz = x.dtype.itemsize
    vmem_est = (
        2 * _round_up(T, 8) * _round_up(C_in, lane) * isz
        + 2 * _round_up(TT, 8) * _round_up(dim, lane) * f32b
        + 4 * 8 * _round_up(dim, lane) * f32b
        + 2 * NTAPS * _round_up(C_in, 8) * _round_up(dim, lane) * w_all.dtype.itemsize
        + _round_up(NT * TT + 2 * MAXPAD, 8) * _round_up(C_in, lane) * isz
    )
    vmem_limit = int(min(max(vmem_est * 3 // 2, 32 * 1024 * 1024), 64 * 1024 * 1024))

    cost = pl.CostEstimate(
        flops=2 * B * T * C_in * dim * NTAPS,
        transcendentals=0,
        bytes_accessed=(x.size * isz + w_all.size * w_all.dtype.itemsize
                        + b_all.size * b_all.dtype.itemsize
                        + B * T * dim * f32b + B * dim * f32b),
    )

    kernel = functools.partial(_encoder_kernel, T=T, TT=TT)

    out, hsum = pl.pallas_call(
        kernel,
        out_shape=(
            jax.ShapeDtypeStruct((B, T, dim), jnp.float32),
            jax.ShapeDtypeStruct((B, 1, dim), jnp.float32),
        ),
        grid_spec=pltpu.PrefetchScalarGridSpec(
            num_scalar_prefetch=0,
            grid=(B, NT),
            in_specs=[
                pl.BlockSpec((1, T, C_in), lambda b, t: (b, 0, 0)),     # resident per b
                pl.BlockSpec(w_all.shape, lambda b, t: (0, 0, 0)),
                pl.BlockSpec(b_all.shape, lambda b, t: (0, 0)),
            ],
            out_specs=[
                pl.BlockSpec((1, TT, dim), lambda b, t: (b, t, 0)),
                pl.BlockSpec((1, 1, dim), lambda b, t: (b, 0, 0)),      # time-sum accumulator
            ],
            scratch_shapes=[
                pltpu.VMEM((NT * TT + 2 * MAXPAD, C_in), x.dtype),      # zero-padded x copy
            ],
        ),
        compiler_params=pltpu.CompilerParams(
            dimension_semantics=("parallel", "arbitrary"),
            vmem_limit_bytes=vmem_limit,
        ),
        cost_estimate=cost,
    )(x, w_all, b_all)

    # TODO(synk): ConformerBlock not provided -> identity; `out` is used directly.
    output = out

    # h0 = sum over time (keepdim) then permute(1, 0, 2); c0 identical.
    h0 = jnp.transpose(hsum, (1, 0, 2))   # (1, B, dim)
    c0 = h0
    return output, (h0, c0)


def init_params(key, in_channels, dim):
    """Deterministic synthetic per-branch parameters. Conv weights as (K, C_in, dim//4)."""
    c4 = dim // 4
    keys = jax.random.split(key, 8)
    params = []
    for i, k_size in enumerate((1, 3, 5, 7)):
        fan_in = in_channels * k_size
        scale = 1.0 / jnp.sqrt(fan_in)
        w = jax.random.uniform(keys[2 * i], (k_size, in_channels, c4),
                               jnp.float32, -scale, scale)
        b = jax.random.uniform(keys[2 * i + 1], (1, c4), jnp.float32, -scale, scale)
        params += [w, b]
    return tuple(params)


def _reference_forward(x, branch_params):
    """Pure-JAX reference of the same computation (per-branch, unfused)."""
    w1, b1, w3, b3, w5, b5, w7, b7 = branch_params
    T = x.shape[1]
    x_p = jnp.pad(x, ((0, 0), (MAXPAD, MAXPAD), (0, 0)))

    def branch(w, b):
        k_size = w.shape[0]
        pad = (k_size - 1) // 2
        acc = jnp.broadcast_to(b[0], (x.shape[0], T, w.shape[2])).astype(jnp.float32)
        for k in range(k_size):
            start = MAXPAD - pad + k
            tap = x_p[:, start:start + T, :]
            acc = acc + jnp.einsum('btc,cd->btd', tap, w[k])
        return jnp.maximum(acc, 0.0)

    out = jnp.concatenate([branch(w1, b1), branch(w3, b3),
                           branch(w5, b5), branch(w7, b7)], axis=-1)
    h = jnp.transpose(jnp.sum(out, axis=1, keepdims=True), (1, 0, 2))
    return out, (h, h)


if __name__ == "__main__":
    B, T, C_in, DIM = 2, 8, 4, 32
    key = jax.random.PRNGKey(0)
    kx, kp = jax.random.split(key)
    x = jax.random.normal(kx, (B, T, C_in), jnp.float32)
    branch_params = init_params(kp, C_in, DIM)
    fused_params = pack_conv_params(branch_params)

    output, (h0, c0) = encoder_forward(x, fused_params)
    jax.block_until_ready((output, h0, c0))

    ref_out, (ref_h0, _) = _reference_forward(x, branch_params)
    assert output.shape == (B, T, DIM)
    assert h0.shape == (1, B, DIM) and c0.shape == (1, B, DIM)
    assert jnp.allclose(output, ref_out, atol=1e-5, rtol=1e-5)
    assert jnp.allclose(h0, ref_h0, atol=1e-4, rtol=1e-5)

    print("KERNEL_OK")
</pallas_src>

<mosaic_0001>
module attributes {stable_mosaic.version = 11 : i64} {
  func.func @_encoder_kernel(%arg0: i32, %arg1: i32, %arg2: memref<1x8x4xf32, #tpu.memory_space<vmem>>, %arg3: memref<7x4x32xf32, #tpu.memory_space<vmem>>, %arg4: memref<1x32xf32, #tpu.memory_space<vmem>>, %arg5: memref<1x8x32xf32, #tpu.memory_space<vmem>>, %arg6: memref<1x1x32xf32, #tpu.memory_space<vmem>>, %arg7: memref<14x4xf32, #tpu.memory_space<vmem>>) attributes {dimension_semantics = [#tpu.dimension_semantics<parallel>, #tpu.dimension_semantics<arbitrary>], iteration_bounds = array<i64: 2, 1>, scalar_prefetch = 0 : i64, scratch_operands = 1 : i64, tpu.core_type = #tpu.core_type<tc>, window_params = [{transform_indices = @transform_0, window_bounds = array<i64: 1, 8, 4>}, {pipeline_mode = #tpu.pipeline_mode<synchronous>, transform_indices = @transform_1, window_bounds = array<i64: 7, 4, 32>}, {pipeline_mode = #tpu.pipeline_mode<synchronous>, transform_indices = @transform_2, window_bounds = array<i64: 1, 32>}, {transform_indices = @transform_3, window_bounds = array<i64: 1, 8, 32>}, {transform_indices = @transform_4, window_bounds = array<i64: 1, 1, 32>}]} {
    %c0_i32 = arith.constant 0 : i32
    %0 = arith.cmpi eq, %arg1, %c0_i32 : i32
    %1 = arith.extui %0 : i1 to i32
    %c0_i32_0 = arith.constant 0 : i32
    %2 = arith.cmpi ne, %1, %c0_i32_0 : i32
    scf.if %2 {
      %cst_43 = arith.constant 0.000000e+00 : f32
      %71 = vector.broadcast %cst_43 : f32 to vector<14x4xf32>
      %c0_44 = arith.constant 0 : index
      %c0_45 = arith.constant 0 : index
      %72 = vector.load %arg7[%c0_44, %c0_45] : memref<14x4xf32, #tpu.memory_space<vmem>>, vector<14x4xf32>
      tpu.vector_store %arg7[%c0_44, %c0_45], %71 {strides = array<i32>} : memref<14x4xf32, #tpu.memory_space<vmem>>, vector<14x4xf32>,
      %c0_46 = arith.constant 0 : index
      %c0_47 = arith.constant 0 : index
      %c0_48 = arith.constant 0 : index
      %73 = vector.load %arg2[%c0_46, %c0_47, %c0_48] : memref<1x8x4xf32, #tpu.memory_space<vmem>>, vector<1x8x4xf32>
      %74 = vector.shape_cast %73 : vector<1x8x4xf32> to vector<8x4xf32>
      %c3_49 = arith.constant 3 : index
      %c0_50 = arith.constant 0 : index
      %75 = vector.load %arg7[%c3_49, %c0_50] : memref<14x4xf32, #tpu.memory_space<vmem>>, vector<8x4xf32>
      tpu.vector_store %arg7[%c3_49, %c0_50], %74 {strides = array<i32>} : memref<14x4xf32, #tpu.memory_space<vmem>>, vector<8x4xf32>,
      %cst_51 = arith.constant 0.000000e+00 : f32
      %76 = vector.broadcast %cst_51 : f32 to vector<1x1x32xf32>
      %c0_52 = arith.constant 0 : index
      %c0_53 = arith.constant 0 : index
      %c0_54 = arith.constant 0 : index
      %77 = vector.load %arg6[%c0_52, %c0_53, %c0_54] : memref<1x1x32xf32, #tpu.memory_space<vmem>>, vector<1x1x32xf32>
      tpu.vector_store %arg6[%c0_52, %c0_53, %c0_54], %76 {strides = array<i32>} : memref<1x1x32xf32, #tpu.memory_space<vmem>>, vector<1x1x32xf32>,
    } else {
    }
    %c8_i32 = arith.constant 8 : i32
    %3 = arith.muli %arg1, %c8_i32 : i32
    %4 = tpu.assume_multiple %3, 8 : i32
    %cst = arith.constant 0.000000e+00 : f32
    %5 = vector.broadcast %cst : f32 to vector<8x32xf32>
    %c0_i32_1 = arith.constant 0 : i32
    %6 = arith.addi %4, %c0_i32_1 : i32
    %7 = arith.index_cast %6 : i32 to index
    %c0 = arith.constant 0 : index
    %8 = vector.load %arg7[%7, %c0] : memref<14x4xf32, #tpu.memory_space<vmem>>, vector<8x4xf32>
    %c0_2 = arith.constant 0 : index
    %c0_3 = arith.constant 0 : index
    %c0_4 = arith.constant 0 : index
    %9 = vector.load %arg3[%c0_2, %c0_3, %c0_4] : memref<7x4x32xf32, #tpu.memory_space<vmem>>, vector<1x4x32xf32>
    %10 = vector.shape_cast %9 : vector<1x4x32xf32> to vector<4x32xf32>
    %cst_5 = arith.constant dense<0.000000e+00> : vector<8x32xf32>
    %11 = tpu.matmul %8, %10, %cst_5 {dimension_numbers = #tpu.dot_dimension_numbers<[1], [0], [0], [1], [0, 0, 1, 1], [], []>} : vector<8x4xf32>, vector<4x32xf32>, vector<8x32xf32> -> vector<8x32xf32>
    %12 = arith.addf %5, %11 : vector<8x32xf32>
    %c1_i32 = arith.constant 1 : i32
    %13 = arith.addi %4, %c1_i32 : i32
    %14 = arith.index_cast %13 : i32 to index
    %c0_6 = arith.constant 0 : index
    %15 = vector.load %arg7[%14, %c0_6] : memref<14x4xf32, #tpu.memory_space<vmem>>, vector<8x4xf32>
    %c1 = arith.constant 1 : index
    %c0_7 = arith.constant 0 : index
    %c0_8 = arith.constant 0 : index
    %16 = vector.load %arg3[%c1, %c0_7, %c0_8] : memref<7x4x32xf32, #tpu.memory_space<vmem>>, vector<1x4x32xf32>
    %17 = vector.shape_cast %16 : vector<1x4x32xf32> to vector<4x32xf32>
    %cst_9 = arith.constant dense<0.000000e+00> : vector<8x32xf32>
    %18 = tpu.matmul %15, %17, %cst_9 {dimension_numbers = #tpu.dot_dimension_numbers<[1], [0], [0], [1], [0, 0, 1, 1], [], []>} : vector<8x4xf32>, vector<4x32xf32>, vector<8x32xf32> -> vector<8x32xf32>
    %19 = arith.addf %12, %18 : vector<8x32xf32>
    %c2_i32 = arith.constant 2 : i32
    %20 = arith.addi %4, %c2_i32 : i32
    %21 = arith.index_cast %20 : i32 to index
    %c0_10 = arith.constant 0 : index
    %22 = vector.load %arg7[%21, %c0_10] : memref<14x4xf32, #tpu.memory_space<vmem>>, vector<8x4xf32>
    %c2 = arith.constant 2 : index
    %c0_11 = arith.constant 0 : index
    %c0_12 = arith.constant 0 : index
    %23 = vector.load %arg3[%c2, %c0_11, %c0_12] : memref<7x4x32xf32, #tpu.memory_space<vmem>>, vector<1x4x32xf32>
    %24 = vector.shape_cast %23 : vector<1x4x32xf32> to vector<4x32xf32>
    %cst_13 = arith.constant dense<0.000000e+00> : vector<8x32xf32>
    %25 = tpu.matmul %22, %24, %cst_13 {dimension_numbers = #tpu.dot_dimension_numbers<[1], [0], [0], [1], [0, 0, 1, 1], [], []>} : vector<8x4xf32>, vector<4x32xf32>, vector<8x32xf32> -> vector<8x32xf32>
    %26 = arith.addf %19, %25 : vector<8x32xf32>
    %c3_i32 = arith.constant 3 : i32
    %27 = arith.addi %4, %c3_i32 : i32
    %28 = arith.index_cast %27 : i32 to index
    %c0_14 = arith.constant 0 : index
    %29 = vector.load %arg7[%28, %c0_14] : memref<14x4xf32, #tpu.memory_space<vmem>>, vector<8x4xf32>
    %c3 = arith.constant 3 : index
    %c0_15 = arith.constant 0 : index
    %c0_16 = arith.constant 0 : index
    %30 = vector.load %arg3[%c3, %c0_15, %c0_16] : memref<7x4x32xf32, #tpu.memory_space<vmem>>, vector<1x4x32xf32>
    %31 = vector.shape_cast %30 : vector<1x4x32xf32> to vector<4x32xf32>
    %cst_17 = arith.constant dense<0.000000e+00> : vector<8x32xf32>
    %32 = tpu.matmul %29, %31, %cst_17 {dimension_numbers = #tpu.dot_dimension_numbers<[1], [0], [0], [1], [0, 0, 1, 1], [], []>} : vector<8x4xf32>, vector<4x32xf32>, vector<8x32xf32> -> vector<8x32xf32>
    %33 = arith.addf %26, %32 : vector<8x32xf32>
    %c4_i32 = arith.constant 4 : i32
    %34 = arith.addi %4, %c4_i32 : i32
    %35 = arith.index_cast %34 : i32 to index
    %c0_18 = arith.constant 0 : index
    %36 = vector.load %arg7[%35, %c0_18] : memref<14x4xf32, #tpu.memory_space<vmem>>, vector<8x4xf32>
    %c4 = arith.constant 4 : index
    %c0_19 = arith.constant 0 : index
    %c0_20 = arith.constant 0 : index
    %37 = vector.load %arg3[%c4, %c0_19, %c0_20] : memref<7x4x32xf32, #tpu.memory_space<vmem>>, vector<1x4x32xf32>
    %38 = vector.shape_cast %37 : vector<1x4x32xf32> to vector<4x32xf32>
    %cst_21 = arith.constant dense<0.000000e+00> : vector<8x32xf32>
    %39 = tpu.matmul %36, %38, %cst_21 {dimension_numbers = #tpu.dot_dimension_numbers<[1], [0], [0], [1], [0, 0, 1, 1], [], []>} : vector<8x4xf32>, vector<4x32xf32>, vector<8x32xf32> -> vector<8x32xf32>
    %40 = arith.addf %33, %39 : vector<8x32xf32>
    %c5_i32 = arith.constant 5 : i32
    %41 = arith.addi %4, %c5_i32 : i32
    %42 = arith.index_cast %41 : i32 to index
    %c0_22 = arith.constant 0 : index
    %43 = vector.load %arg7[%42, %c0_22] : memref<14x4xf32, #tpu.memory_space<vmem>>, vector<8x4xf32>
    %c5 = arith.constant 5 : index
    %c0_23 = arith.constant 0 : index
    %c0_24 = arith.constant 0 : index
    %44 = vector.load %arg3[%c5, %c0_23, %c0_24] : memref<7x4x32xf32, #tpu.memory_space<vmem>>, vector<1x4x32xf32>
    %45 = vector.shape_cast %44 : vector<1x4x32xf32> to vector<4x32xf32>
    %cst_25 = arith.constant dense<0.000000e+00> : vector<8x32xf32>
    %46 = tpu.matmul %43, %45, %cst_25 {dimension_numbers = #tpu.dot_dimension_numbers<[1], [0], [0], [1], [0, 0, 1, 1], [], []>} : vector<8x4xf32>, vector<4x32xf32>, vector<8x32xf32> -> vector<8x32xf32>
    %47 = arith.addf %40, %46 : vector<8x32xf32>
    %c6_i32 = arith.constant 6 : i32
    %48 = arith.addi %4, %c6_i32 : i32
    %49 = arith.index_cast %48 : i32 to index
    %c0_26 = arith.constant 0 : index
    %50 = vector.load %arg7[%49, %c0_26] : memref<14x4xf32, #tpu.memory_space<vmem>>, vector<8x4xf32>
    %c6 = arith.constant 6 : index
    %c0_27 = arith.constant 0 : index
    %c0_28 = arith.constant 0 : index
    %51 = vector.load %arg3[%c6, %c0_27, %c0_28] : memref<7x4x32xf32, #tpu.memory_space<vmem>>, vector<1x4x32xf32>
    %52 = vector.shape_cast %51 : vector<1x4x32xf32> to vector<4x32xf32>
    %cst_29 = arith.constant dense<0.000000e+00> : vector<8x32xf32>
    %53 = tpu.matmul %50, %52, %cst_29 {dimension_numbers = #tpu.dot_dimension_numbers<[1], [0], [0], [1], [0, 0, 1, 1], [], []>} : vector<8x4xf32>, vector<4x32xf32>, vector<8x32xf32> -> vector<8x32xf32>
    %54 = arith.addf %47, %53 : vector<8x32xf32>
    %c0_30 = arith.constant 0 : index
    %c0_31 = arith.constant 0 : index
    %55 = vector.load %arg4[%c0_30, %c0_31] : memref<1x32xf32, #tpu.memory_space<vmem>>, vector<1x32xf32>
    %56 = vector.broadcast %55 : vector<1x32xf32> to vector<8x32xf32>
    %57 = arith.addf %54, %56 : vector<8x32xf32>
    %cst_32 = arith.constant 0.000000e+00 : f32
    %58 = vector.broadcast %cst_32 : f32 to vector<8x32xf32>
    %59 = arith.maximumf %57, %58 : vector<8x32xf32>
    %c0_33 = arith.constant 0 : index
    %c0_34 = arith.constant 0 : index
    %c0_35 = arith.constant 0 : index
    %60 = vector.load %arg5[%c0_33, %c0_34, %c0_35] : memref<1x8x32xf32, #tpu.memory_space<vmem>>, vector<1x8x32xf32>
    %61 = vector.shape_cast %60 : vector<1x8x32xf32> to vector<8x32xf32>
    %62 = vector.shape_cast %59 : vector<8x32xf32> to vector<1x8x32xf32>
    tpu.vector_store %arg5[%c0_33, %c0_34, %c0_35], %62 {strides = array<i32>} : memref<1x8x32xf32, #tpu.memory_space<vmem>>, vector<1x8x32xf32>,
    %cst_36 = arith.constant dense<0.000000e+00> : vector<32xf32>
    %63 = vector.multi_reduction <add>, %59, %cst_36 [0] : vector<8x32xf32> to vector<32xf32>
    %64 = vector.shape_cast %63 : vector<32xf32> to vector<1x32xf32>
    %c0_37 = arith.constant 0 : index
    %c0_38 = arith.constant 0 : index
    %c0_39 = arith.constant 0 : index
    %65 = vector.load %arg6[%c0_37, %c0_38, %c0_39] : memref<1x1x32xf32, #tpu.memory_space<vmem>>, vector<1x1x32xf32>
    %66 = vector.shape_cast %65 : vector<1x1x32xf32> to vector<1x32xf32>
    %67 = arith.addf %66, %64 : vector<1x32xf32>
    %c0_40 = arith.constant 0 : index
    %c0_41 = arith.constant 0 : index
    %c0_42 = arith.constant 0 : index
    %68 = vector.load %arg6[%c0_40, %c0_41, %c0_42] : memref<1x1x32xf32, #tpu.memory_space<vmem>>, vector<1x1x32xf32>
    %69 = vector.shape_cast %68 : vector<1x1x32xf32> to vector<1x32xf32>
    %70 = vector.shape_cast %67 : vector<1x32xf32> to vector<1x1x32xf32>
    tpu.vector_store %arg6[%c0_40, %c0_41, %c0_42], %70 {strides = array<i32>} : memref<1x1x32xf32, #tpu.memory_space<vmem>>, vector<1x1x32xf32>,
    return
  }
  func.func @transform_0(%arg0: i32, %arg1: i32) -> (i32, i32, i32) {
    %c0_i32 = arith.constant 0 : i32
    %c0_i32_0 = arith.constant 0 : i32
    %c0_i32_1 = arith.constant 0 : i32
    return %arg0, %c0_i32, %c0_i32_0 : i32, i32, i32
  }
  func.func @transform_1(%arg0: i32, %arg1: i32) -> (i32, i32, i32) {
    %c0_i32 = arith.constant 0 : i32
    %c0_i32_0 = arith.constant 0 : i32
    %c0_i32_1 = arith.constant 0 : i32
    %c0_i32_2 = arith.constant 0 : i32
    return %c0_i32, %c0_i32_0, %c0_i32_1 : i32, i32, i32
  }
  func.func @transform_2(%arg0: i32, %arg1: i32) -> (i32, i32) {
    %c0_i32 = arith.constant 0 : i32
    %c0_i32_0 = arith.constant 0 : i32
    %c0_i32_1 = arith.constant 0 : i32
    return %c0_i32, %c0_i32_0 : i32, i32
  }
  func.func @transform_3(%arg0: i32, %arg1: i32) -> (i32, i32, i32) {
    %c0_i32 = arith.constant 0 : i32
    %c0_i32_0 = arith.constant 0 : i32
    return %arg0, %arg1, %c0_i32 : i32, i32, i32
  }
  func.func @transform_4(%arg0: i32, %arg1: i32) -> (i32, i32, i32) {
    %c0_i32 = arith.constant 0 : i32
    %c0_i32_0 = arith.constant 0 : i32
    %c0_i32_1 = arith.constant 0 : i32
    return %arg0, %c0_i32, %c0_i32_0 : i32, i32, i32
  }
}

</mosaic_0001>

<bundles_post_ra>
// kernel: tpu_custom_call.1
= control target key start
LH: loop header
LB: loop body
LE: loop exit
PB: predicated region body
PF: predicated region fallthrough
CT: control target
= control target key end

     0   :  { %10 = vsyncpa [#allocation4], 0  ;;  %s1553_s0 = inlined_call_operand.vmem [shape: f32[2,8,4], index: 0, kind: input, shape index: {}]   ;;  %s1554_s1 = inlined_call_operand.hbm [shape: f32[7,4,32], index: 1, kind: input, shape index: {}]   ;;  %s1555_s2 = inlined_call_operand.vmem [shape: f32[1,32], index: 2, kind: input, shape index: {}]   ;;  %s1556_s3 = inlined_call_operand.hbm [shape: f32[2,8,32], index: 3, kind: output, shape index: {0}]   ;;  %s1557_s4 = inlined_call_operand.hbm [shape: f32[2,1,32], index: 4, kind: output, shape index: {1}]  }
   0x1   :  { %11 = vsyncpa [#allocation5], 0 }
   0x2   :  { %13 = vsyncpa [#allocation5 + $0x1], 0 }
   0x3   :  { %14 = vsyncpa [#allocation8], 0 }
   0x4   :  { %16 = vsyncpa [#allocation8 + $0x1], 0  ;;  %s1334_s15 = smov 0   ;;  %s1336_s16 = smov 0  }
   0x5   :  { %s1338_s17 = smov 0   ;;  %s1340_s18 = smov 0  }
   0x6   :  { %s1342_s19 = smov 0   ;;  %s1344_s20 = smov 0  }
   0x7 LB: > { %s999_s21 = sadd.s32 4294967295, %s1300_s20   ;;  %s1000_s22 = sadd.s32 4294967294, %s1300_s20   ;;  %s1300_s20 = sphi %s1344_s20, %s22_s20   ;;  %s1296_s19 = sphi %s1342_s19, %s1575_s19   ;;  %s1292_s18 = sphi %s1340_s18, %s1574_s18   ;;  %s1288_s17 = sphi %s1338_s17, %s1573_s17   ;;  %s1284_s16 = sphi %s1336_s16, %s1572_s16   ;;  %s1280_s15 = sphi %s1334_s15, %s1571_s15  }
   0x8   : > { %s34_s23 = sadd.s32 1, %s1296_s19  ;;  %s111_s24 = sadd.s32 1, %s1288_s17 }
   0x9   : > { %p36_p0 = scmp.ge.s32.totalorder %s34_s23, 2  ;;  %p121_p1 = scmp.ne.s32.totalorder %s1288_s17, %s1284_s16 }
   0xa   : > { %p122_p2 = scmp.eq.s32.totalorder %s999_s21, 1  ;;  %p127_p3 = scmp.ne.s32.totalorder %s1284_s16, %s1280_s15 }
   0xb   : > { %s1577_s23 = smov (%p36_p0, %s34_s23), 0  ;;  %p128_p5 = scmp.eq.s32.totalorder %s1000_s22, 1 }
   0xc   : > { %p1374_p4 = por %p122_p2, %p121_p1  ;;  %s106_s26 = ssub.s32 %s1296_s19, %s1577_s23 }
   0xd   : > { %p1001_p6 = scmp.ge.s32.totalorder %s1300_s20, 1  ;;  %p109_p7 = scmp.eq.s32.totalorder %s106_s26, 0 }
   0xe   : > { %s1562_s25 = scalar_select %p1374_p4, 1, 0 }
   0xf   : > { %p1381_p8 = por %p128_p5, %p127_p3  ;;  %p161_p9 = scmp.lt.s32.totalorder %s1300_s20, 3 }
  0x10   : > { %s1387_s28 = scalar_select %p109_p7, %s1288_s17, %s111_s24  }
  0x11   : > { %s1563_s27 = scalar_select %p1381_p8, 1, 0 }
  0x12   : > { %p1389_p10 = pnand %p1001_p6, %p161_p9  ;;  %p1393_p11 = scmp.eq.s32.totalorder %s999_s21, 0 }
  0x13   : > { %s1302_s5 = smov [#allocation3]   ;;  %s1158_s10 = scalar_lea.hbm %s1554_s1, 448 }
  0x14   : > { %s1564_s29 = scalar_select %p1389_p10, 1, 0 }
  0x15   : > { %s1565_s30 = scalar_select %p1393_p11, 1, 0 }
  0x16   : > { %p1091_p12 = pneg %p1389_p10  ;;  %s173_s6 = sshll.u32 %s1302_s5, 4  ;;  %s174_s6 = int_to_ptr.vmem [resolvable:$true] %s173_s6 }
  0x17   : > { %p1159_p0 = scmp.ne.s32.totalorder %s1554_s1, %s1158_s10  ;;  %p1165_p5 = scmp.lt.u32.totalorder %s1158_s10, %s1554_s1 }
  0x18   : > { %p1401_p13 = pnand %p1393_p11, %p1091_p12 }
  0x1a   : > { %p1160_p1 = pneg %p1401_p13 }
  0x1c   : > { %p1161_p2 = pnand %p1160_p1, %p1159_p0 }
  0x1e   : > { %p1162_p3 = pneg %p1161_p2 }
  0x20   : > { %p1167_p6 = pnand %p1165_p5, %p1162_p3 }
  0x22   : > { %1170 = shalt.err (!%p1167_p6)
}
  0x23   : > { %s1171_s21 = scalar_lea.vmem %s174_s6, 448  ;;  %p1179_p8 = scmp.lt.s32.totalorder %s174_s6, %s174_s6 }
  0x24   : > { %p1172_p7 = scmp.ne.s32.totalorder %s174_s6, %s1171_s21  ;;  %p1180_p4 = scmp.lt.s32.totalorder %s1171_s21, %s1171_s21 }
  0x26   : > { %p1174_p9 = pnand %p1172_p7, %p1160_p1  ;;  %p1181_p11 = por %p1180_p4, %p1179_p8 }
  0x28   : > { %p1175_p12 = pneg %p1174_p9 }
  0x2a   : > { %p1182_p10 = pnand %p1181_p11, %p1175_p12 }
  0x2c   : > { %1185 = shalt.err (!%p1182_p10)
}
  0x2d   : > { %s1303_s22 = smov 64   ;;  %s1304_s24 = smov 4  }
  0x2e   : > { %1094 = dma.hbm_to_vmem [thread:$0]  (!%p1401_p13), %s1554_s1, 448, %s174_s6, [#allocation4], %s1303_s22, %s1303_s22, %s1304_s24  }
  0x2f   : > { %p1567_p0 = scmp.ne.s32.totalorder %s1564_s29, 0 }
  0x30   : > { %p1568_p2 = scmp.ne.s32.totalorder (!%p1567_p0), %s1565_s30, 0 }
  0x31   : > { %199 = sbr.rel (%p1567_p0) target bundleno = 342 (0x156), region = 32 }
  0x38   : > { %1267 = dma.done.wait (%p1568_p2), [#allocation4], 448  }
  0x39   : > { %1269 = vsyncadd (%p1568_p2), [#allocation4], 4294966848  ;;  %p228_p4 = scmp.lt.s32.totalorder %s1292_s18, 1  ;;  %v1305_v0 = vmov 0.0   ;;  %vm236_vm0 = vcmask 31744   ;;  %vm238_vm1 = vcmask 29696  }
  0x3a   : > { %1048 = vmatprep.subr.mxu0 %v1305_v0  ;;  %1053 = vmatprep.subr.mxu1 %v1305_v0  ;;  %vm1306_vm2 = vmmov 0   ;;  %237 = vst.msk [vmem:[#allocation2] sm:$0xff] %vm236_vm0, %v1305_v0  ;;  %vm257_vm3 = vcmask 1043456   ;;  %v252_v1 = vld [vmem:[#allocation3 + $0x4] sm:$0xf]  ;;  %s1456_s9 = sand.u32 1, %s1284_s16  }
  0x3b   : > { %1050 = vmatprep.mubr.msk.f32.mxu0 %vm1306_vm2, %v1305_v0  ;;  %1055 = vmatprep.mubr.msk.f32.mxu1 %vm1306_vm2, %v1305_v0  ;;  %s229_s29 = scalar_select %p228_p4, %s1292_s18, 1  ;;  %239 = vst.msk [vmem:[#allocation2 + $0x8] sm:$0x3f] %vm238_vm1, %v1305_v0  ;;  %v247_v2 = vld [vmem:[#allocation3] sm:$0xf]  ;;  %vm242_vm4 = vcmask 253952  }
  0x3c   : > { %1049 = vmatpush3.msk.msra.mxu0 %vm257_vm3, %v252_v1  ;;  %1054 = vmatpush3.msk.msra.mxu1 %vm257_vm3, %v247_v2  ;;  %v411_v4 = vld [vmem:[#allocation3 + $0x8] sm:$0xf]  ;;  %v493_v5 = vld [vmem:[#allocation3 + $0xc] sm:$0xf]  ;;  %v575_v10 = vld [vmem:[#allocation3 + $0x10] sm:$0xf] }
  0x3d   : > { %s1007_s6 = sshll.u32 %s229_s29, 3  ;;  %1058 = vmatprep.subr.mxu0 %v1305_v0  ;;  %1063 = vmatprep.subr.mxu1 %v1305_v0  ;;  %v657_v11 = vld [vmem:[#allocation3 + $0x14] sm:$0xf]  ;;  %v739_v14 = vld [vmem:[#allocation3 + $0x18] sm:$0xf]  ;;  %s1459_s10 = scalar_lea.vmem [#allocation7], %s1456_s9 }
  0x3e   : > { %s231_s8 = scalar_lea.vmem %s1553_s0, %s1007_s6  ;;  %243 = vst.msk [vmem:[%s1459_s10] sm:$0x1] %vm242_vm4, %v1305_v0  ;;  %s1006_s11 = sshll.u32 %s1456_s9, 3  ;;  %v1028_v34 = vld [vmem:[%s1555_s2] ss:$0 sm:$0xff]  ;;  %vm826_vm5 = vcmask 261120  }
  0x3f   : > { %v240_v3 = vld [vmem:[%s231_s8] sm:$0xff]  ;;  %s1030_s14 = sshll.u32 %s1292_s18, 7  ;;  %s221_s21 = scalar_lea.vmem [#allocation6], %s1006_s11 }
  0x40   : > { %241 = vst.msk [vmem:[#allocation2 + $0x3] sm:$0xff] %vm236_vm0, %v240_v3  ;;  %s858_s22 = sshll.u32 %s221_s21, 4  ;;  %s1471_s5 = scalar_lea.hbm %s1556_s3, %s1030_s14  ;;  %s1473_s22 = int_to_ptr.vmem [resolvable:$true] %s858_s22 }
  0x41   : > { %s840_s29 = scalar_lea.sflag [#allocation5], %s1456_s9  ;;  %s1186_s6 = scalar_lea.vmem %s1473_s22, 128 }
  0x42   : > { %p1187_p8 = scmp.ne.s32.totalorder %s1473_s22, %s1186_s6  ;;  %p1569_p10 = scmp.ne.s32.totalorder %s1562_s25, 0 }
  0x43   : > { %s1307_s30 = smov [#allocation6]  }
  0x44   : > { %p1188_p11 = pnand %p1187_p8, %p1569_p10  ;;  %s1190_s7 = sshll.u32 %s1307_s30, 4  ;;  %s1191_s7 = int_to_ptr.vmem [resolvable:$false] %s1190_s7 }
  0x45   : > { %s1192_s8 = scalar_lea.vmem %s1191_s7, 256  ;;  %p1193_p1 = scmp.lt.s32.totalorder %s1473_s22, %s1191_s7 }
  0x46   : > { %p1189_p13 = pneg %p1188_p11  ;;  %p1194_p3 = scmp.lt.s32.totalorder %s1192_s8, %s1186_s6 }
  0x47   : > { %v1008_v6 = vld [vmem:[#allocation2 + $0x1] sm:$0xff] }
  0x48   : > { %v246_v7 = vld [vmem:[#allocation2] sm:$0xff]  ;;  %1051 = vmatmul.mubr.msk.f32.vlgmr.msra.gmra.mrb[0].mxu0 %vm236_vm0, %v1008_v6  ;;  %p1195_p5 = por %p1194_p3, %p1193_p1 }
  0x49   : > { %1056 = vmatmul.mubr.msk.f32.vlgmr.msra.gmra.mrb[0].mxu1 %vm236_vm0, %v246_v7  ;;  %1059 = vmatpush3.msk.msra.mxu0 %vm257_vm3, %v411_v4  ;;  %v1013_v8 = vld [vmem:[#allocation2 + $0x2] sm:$0xff] }
  0x4a   : > { %1064 = vmatpush3.msk.msra.mxu1 %vm257_vm3, %v493_v5  ;;  %v1016_v9 = vld [vmem:[#allocation2 + $0x3] sm:$0xff]  ;;  %1060 = vmatprep.mubr.msk.f32.mxu0 %vm1306_vm2, %v1305_v0  ;;  %p1196_p6 = pnand %p1195_p5, %p1189_p13 }
  0x4b   : > { %1068 = vmatprep.subr.mxu0 %v1305_v0  ;;  %1065 = vmatprep.mubr.msk.f32.mxu1 %vm1306_vm2, %v1305_v0  ;;  %v1019_v12 = vld [vmem:[#allocation2 + $0x4] sm:$0xff] }
  0x4c   : > { %1073 = vmatprep.subr.mxu1 %v1305_v0  ;;  %1061 = vmatmul.mubr.msk.f32.vlgmr.msra.gmra.mrb[2].mxu0 %vm236_vm0, %v1013_v8  ;;  %v1022_v13 = vld [vmem:[#allocation2 + $0x5] sm:$0xff] }
  0x4d   : > { %1066 = vmatmul.mubr.msk.f32.vlgmr.msra.gmra.mrb[2].mxu1 %vm236_vm0, %v1016_v9  ;;  %1069 = vmatpush3.msk.msra.mxu0 %vm257_vm3, %v575_v10  ;;  %v1025_v15 = vld [vmem:[#allocation2 + $0x6] sm:$0xff] }
  0x4e   : > { %1074 = vmatpush3.msk.msra.mxu1 %vm257_vm3, %v657_v11  ;;  %1070 = vmatprep.mubr.msk.f32.mxu0 %vm1306_vm2, %v1305_v0 }
  0x4f   : > { %1078 = vmatprep.subr.mxu0 %v1305_v0  ;;  %1075 = vmatprep.mubr.msk.f32.mxu1 %vm1306_vm2, %v1305_v0 }
  0x50   : > { %1071 = vmatmul.mubr.msk.f32.vlgmr.msra.gmra.mrb[4].mxu0 %vm236_vm0, %v1019_v12 }
  0x51   : > { %1076 = vmatmul.mubr.msk.f32.vlgmr.msra.gmra.mrb[4].mxu1 %vm236_vm0, %v1022_v13  ;;  %1079 = vmatpush3.msk.msra.mxu0 %vm257_vm3, %v739_v14 }
  0x52   : > { %1080 = vmatprep.mubr.msk.f32.mxu0 %vm1306_vm2, %v1305_v0 }
  0x54   : > { %1081 = vmatmul.mubr.msk.f32.vlgmr.msra.gmra.mrb[6].mxu0 %vm236_vm0, %v1025_v15 }
 0x11b   : > { %v327_v16 = vpop.f32.mrb[0].mxu0 }
 0x11c   : > { %v403_v17 = vpop.f32.mrb[0].mxu1  ;;  %v1052_v19 = vpop.f32.mrb[1].mxu0 }
 0x11d   : > { %v404_v18 = vadd.f32 %v403_v17, %v327_v16  ;;  %v1057_v20 = vpop.f32.mrb[1].mxu1 }
 0x11f   : > { %v484_v21 = vpop.f32.mrb[2].mxu0 }
 0x120   : > { %v566_v22 = vpop.f32.mrb[2].mxu1  ;;  %v488_v23 = vadd.f32 %v484_v21, %v404_v18  ;;  %v1062_v24 = vpop.f32.mrb[3].mxu0 }
 0x121   : > { %v1067_v25 = vpop.f32.mrb[3].mxu1 }
 0x122   : > { %v570_v26 = vadd.f32 %v566_v22, %v488_v23 }
 0x123   : > { %v648_v27 = vpop.f32.mrb[4].mxu0 }
 0x124   : > { %v730_v28 = vpop.f32.mrb[4].mxu1  ;;  %v652_v29 = vadd.f32 %v648_v27, %v570_v26  ;;  %v1072_v30 = vpop.f32.mrb[5].mxu0 }
 0x125   : > { %v1077_v31 = vpop.f32.mrb[5].mxu1 }
 0x126   : > { %v734_v32 = vadd.f32 %v730_v28, %v652_v29 }
 0x127   : > { %v812_v33 = vpop.f32.mrb[6].mxu0 }
 0x128   : > { %v816_v35 = vadd.f32 %v812_v33, %v734_v32  ;;  %v1082_v36 = vpop.f32.mrb[7].mxu0 }
 0x12a   : > { %v824_v37 = vadd.f32 %v1028_v34, %v816_v35 }
 0x12c   : > { %v825_v38 = vmax.f32 %v824_v37, 0.0 }
 0x12e   : > { %v828_v39 = vsel %vm826_vm5, %v825_v38, 0.0  ;;  %827 = vst.msk [vmem:[%s221_s21] sm:$0xff] %vm826_vm5, %v825_v38 }
 0x12f   : > { %v829_v40 = vrot.slane %v828_v39, 4 }
 0x130   : > { %1199 = shalt.err (!%p1196_p6)
}
 0x131   : > { %s1200_s11 = scalar_lea.hbm %s1471_s5, 128  ;;  %s1204_s14 = scalar_lea.hbm %s1556_s3, 256 }
 0x132   : > { %p1201_p7 = scmp.ne.s32.totalorder %s1471_s5, %s1200_s11  ;;  %p1205_p0 = scmp.lt.u32.totalorder %s1471_s5, %s1556_s3 }
 0x133   : > { %p1206_p2 = scmp.lt.u32.totalorder %s1204_s14, %s1200_s11  ;;  %p1208_p8 = scmp.lt.u32.totalorder %s1200_s11, %s1471_s5 }
 0x134   : > { %p1202_p9 = pnand %p1201_p7, %p1569_p10 }
 0x135   : > { %p1207_p4 = por %p1206_p2, %p1205_p0 }
 0x136   : > { %p1203_p12 = pneg %p1202_p9 }
 0x137   : > { %p1209_p11 = por %p1208_p8, %p1207_p4 }
 0x139   : > { %p1210_p13 = pnand %p1209_p11, %p1203_p12 }
 0x13b   : > { %1213 = shalt.err (!%p1210_p13)
}
 0x13c   : > { %1087 = dma.vmem_to_hbm [thread:$0]  (%p1569_p10), %s1473_s22, 128, %s1471_s5, %s840_s29   ;;  %v830_v41 = vadd.f32 %v829_v40, %v828_v39  ;;  %v835_v45 = vld [vmem:[%s1459_s10] sm:$0x1] }
 0x13d   : > { %s1031_s26 = sshll.u32 %s1292_s18, 4  ;;  %s871_s6 = sshll.u32 %s1459_s10, 4  ;;  %s1505_s6 = int_to_ptr.vmem [resolvable:$true] %s871_s6 }
 0x13e   : > { %v831_v42 = vrot.slane %v830_v41, 2  ;;  %s1503_s8 = scalar_lea.hbm %s1557_s4, %s1031_s26  ;;  %s845_s22 = scalar_lea.sflag [#allocation8], %s1456_s9 }
 0x13f   : > { %s1214_s5 = scalar_lea.vmem %s1505_s6, 16  ;;  %s1308_s18 = smov [#allocation7]  }
 0x140   : > { %v832_v43 = vadd.f32 %v831_v42, %v830_v41  ;;  %p1215_p1 = scmp.ne.s32.totalorder %s1505_s6, %s1214_s5  ;;  %s1218_s29 = sshll.u32 %s1308_s18, 4  ;;  %s1219_s29 = int_to_ptr.vmem [resolvable:$false] %s1218_s29 }
 0x141   : > { %s1220_s11 = scalar_lea.vmem %s1219_s29, 32  ;;  %p1221_p6 = scmp.lt.s32.totalorder %s1505_s6, %s1219_s29 }
 0x142   : > { %v833_v44 = vrot.slane %v832_v43, 1  ;;  %p1216_p3 = pnand %p1215_p1, %p1569_p10  ;;  %p1222_p7 = scmp.lt.s32.totalorder %s1220_s11, %s1214_s5 }
 0x144   : > { %v834_v46 = vadd.f32 %v833_v44, %v832_v43  ;;  %p1217_p5 = pneg %p1216_p3  ;;  %p1223_p9 = por %p1222_p7, %p1221_p6 }
 0x146   : > { %v836_v47 = vadd.f32 %v835_v45, %v834_v46  ;;  %p1224_p12 = pnand %p1223_p9, %p1217_p5 }
 0x148   : > { %838 = vst.msk [vmem:[%s1459_s10] sm:$0x1] %vm242_vm4, %v836_v47 }
 0x149   : > { %1227 = shalt.err (!%p1224_p12)
}
 0x14a   : > { %s1228_s9 = scalar_lea.hbm %s1503_s8, 16  ;;  %s1232_s13 = scalar_lea.hbm %s1557_s4, 32 }
 0x14b   : > { %p1229_p0 = scmp.ne.s32.totalorder %s1503_s8, %s1228_s9  ;;  %p1233_p8 = scmp.lt.u32.totalorder %s1503_s8, %s1557_s4 }
 0x14c   : > { %p1234_p11 = scmp.lt.u32.totalorder %s1232_s13, %s1228_s9  ;;  %p1236_p1 = scmp.lt.u32.totalorder %s1228_s9, %s1503_s8 }
 0x14d   : > { %p1230_p2 = pnand %p1229_p0, %p1569_p10 }
 0x14e   : > { %p1235_p13 = por %p1234_p11, %p1233_p8 }
 0x14f   : > { %p1231_p4 = pneg %p1230_p2 }
 0x150   : > { %p1237_p3 = por %p1236_p1, %p1235_p13 }
 0x152   : > { %p1238_p5 = pnand %p1237_p3, %p1231_p4 }
 0x154   : > { %1241 = shalt.err (!%p1238_p5)
}
 0x155   : > { %1088 = dma.vmem_to_hbm [thread:$0]  (%p1569_p10), %s1505_s6, 16, %s1503_s8, %s845_s22  }
 0x156 PF: > { %p1104_p6 = scmp.ge.s32.totalorder %s1300_s20, 2  ;;  %s883_s24 = sand.u32 1, %s1280_s15  }
 0x157   : > { %p1570_p7 = scmp.ne.s32.totalorder %s1563_s27, 0  ;;  %s884_s26 = scalar_lea.sflag [#allocation5], %s883_s24 }
 0x159   : > { %p1096_p9 = pnand %p1104_p6, %p1570_p7 }
 0x15b   : > { %1271 = dma.done.wait (!%p1096_p9), %s884_s26, 128  }
 0x15c   : > { %1273 = vsyncadd (!%p1096_p9), %s884_s26, 4294967168  ;;  %s893_s30 = scalar_lea.sflag [#allocation8], %s883_s24 }
 0x15d   : > { %1275 = dma.done.wait (!%p1096_p9), %s893_s30, 16  }
 0x15e   : > { %1277 = vsyncadd (!%p1096_p9), %s893_s30, 4294967280  ;;  %s22_s20 = sadd.s32 1, %s1300_s20   ;;  %s1571_s15 = smov %s1284_s16 }
 0x15f   : > { %p19_p12 = scmp.ge.s32.totalorder %s22_s20, 4   ;;  %s1572_s16 = smov %s1288_s17 }
 0x160   : > { %s1573_s17 = smov %s1387_s28  ;;  %s1574_s18 = smov %s1296_s19 }
 0x161   : > { %s1575_s19 = smov %s1577_s23  ;;  %21 = sbr.rel (!%p19_p12) target bundleno = 7 (0x7), region = 106 }
 0x168   :  { %897 = vsyncpa [#allocation4], 1 }
 0x169   :  { %899 = vsyncpa [#allocation4 + $0x1], 1 }
 0x16a   :  { %900 = vsyncpa [#allocation5], 1 }
 0x16b   :  { %902 = vsyncpa [#allocation5 + $0x1], 1 }
 0x16c   :  { %903 = vsyncpa [#allocation8], 1 }
 0x16d   :  { %905 = vsyncpa [#allocation8 + $0x1], 1 }

</bundles_post_ra>
